<compile_context>
chip_gen: v7x
topology: tpu7x:2x2x1
jax: 0.10.0
libtpu: 0.0.40
codegen_flags: <defaults>
</compile_context>

<pallas_src>
import jax
import jax.numpy as jnp
from jax.experimental import pallas as pl
from jax.experimental.pallas import tpu as pltpu


def _round_up(x, m):
    return ((x + m - 1) // m) * m


def _patch_embed_kernel(x_ref, w_ref, b_ref, pos_ref, o_ref):
    # x_ref:   (1, tm, Kp)   im2col patch-vector tile for one batch element
    # w_ref:   (Kp, Cp)      flattened conv weight (resident, constant index_map)
    # b_ref:   (1, Cp)       conv bias
    # pos_ref: (tm, Cp)      position-embedding tile (shared across batch)
    # o_ref:   (1, tm, Cp)
    x = x_ref[0]                                   # (tm, Kp), native dtype -> MXU
    acc = jnp.dot(x, w_ref[...], preferred_element_type=jnp.float32)
    acc = acc + b_ref[...].astype(jnp.float32) + pos_ref[...].astype(jnp.float32)
    # Dropout(0.1) -> identity in eval mode.
    o_ref[0] = acc.astype(o_ref.dtype)


def channel_embeddings_pallas(x, conv_w, conv_b, pos_emb, patch_size, *, tm=256):
    """Forward of Channel_Embeddings.

    x:       (B, C_in, H, W)
    conv_w:  (C_out, C_in, p, p)   (PyTorch Conv2d layout)
    conv_b:  (C_out,)
    pos_emb: (1, n_patches, C_out)
    Returns: (B, n_patches, C_out)
    """
    if x is None:                       # mirror PyTorch forward's None passthrough
        return None

    B, C_in, H, W = x.shape
    p = patch_size
    Hp, Wp = H // p, W // p
    n_patches = Hp * Wp
    C_out = conv_w.shape[0]
    K = C_in * p * p

    # im2col: (B,C,Hp,p,Wp,p) -> (B,Hp,Wp,C,p,p) -> (B, n_patches, K).
    # K-ordering (C_in, kh, kw) matches the flattened conv weight.
    xp = (x.reshape(B, C_in, Hp, p, Wp, p)
            .transpose(0, 2, 4, 1, 3, 5)
            .reshape(B, n_patches, K))

    # Conv weight -> (K, C_out) so the kernel does rows @ W directly.
    w = conv_w.reshape(C_out, K).T

    # Lane-dense / tile-aligned padding (128-lane last dims, 8-aligned row tile).
    LANE = 128
    K_pad = _round_up(K, LANE)
    C_pad = _round_up(C_out, LANE)
    tm = min(tm, _round_up(n_patches, 8))
    Np_pad = _round_up(n_patches, tm)

    xp = jnp.pad(xp, ((0, 0), (0, Np_pad - n_patches), (0, K_pad - K)))
    w = jnp.pad(w, ((0, K_pad - K), (0, C_pad - C_out)))
    b2 = jnp.pad(conv_b.reshape(1, C_out), ((0, 0), (0, C_pad - C_out)))
    pos = jnp.pad(pos_emb.reshape(n_patches, C_out),
                  ((0, Np_pad - n_patches), (0, C_pad - C_out)))

    grid = (B, Np_pad // tm)

    out = pl.pallas_call(
        _patch_embed_kernel,
        out_shape=jax.ShapeDtypeStruct((B, Np_pad, C_pad), x.dtype),
        grid_spec=pltpu.PrefetchScalarGridSpec(
            num_scalar_prefetch=0,
            grid=grid,
            in_specs=[
                pl.BlockSpec((1, tm, K_pad), lambda b, i: (b, i, 0)),   # patch rows
                pl.BlockSpec((K_pad, C_pad), lambda b, i: (0, 0)),      # weight (resident)
                pl.BlockSpec((1, C_pad), lambda b, i: (0, 0)),          # bias   (resident)
                pl.BlockSpec((tm, C_pad), lambda b, i: (i, 0)),         # pos-emb tile
            ],
            out_specs=pl.BlockSpec((1, tm, C_pad), lambda b, i: (b, i, 0)),
        ),
        compiler_params=pltpu.CompilerParams(
            dimension_semantics=("parallel", "parallel"),
            vmem_limit_bytes=64 * 1024 * 1024,
        ),
    )(xp, w, b2, pos)

    # Strip padding back to the logical shape.
    return out[:, :n_patches, :C_out]


def channel_embeddings_reference(x, conv_w, conv_b, pos_emb, patch_size):
    """Pure-JAX reference using lax.conv (independent of the im2col path)."""
    p = patch_size
    y = jax.lax.conv_general_dilated(
        x, conv_w, window_strides=(p, p), padding="VALID",
        dimension_numbers=("NCHW", "OIHW", "NCHW"))
    y = y + conv_b.reshape(1, -1, 1, 1)
    B, C, Hp, Wp = y.shape
    y = y.reshape(B, C, Hp * Wp).transpose(0, 2, 1)
    return y + pos_emb


if __name__ == "__main__":
    key = jax.random.PRNGKey(0)
    kx, kw, kb, kp = jax.random.split(key, 4)

    # Small demo shapes: batch=2, in_channels=8, img=16x16, patch=4 -> 16 patches, K=128.
    batch, in_channels, img_size, patchsize = 2, 8, 16, 4
    n_patches = (img_size // patchsize) * (img_size // patchsize)

    x = jax.random.normal(kx, (batch, in_channels, img_size, img_size), dtype=jnp.float32)
    conv_w = 0.1 * jax.random.normal(
        kw, (in_channels, in_channels, patchsize, patchsize), dtype=jnp.float32)
    conv_b = 0.1 * jax.random.normal(kb, (in_channels,), dtype=jnp.float32)
    # PyTorch initializes position_embeddings to zeros; use random values here to
    # actually exercise the fused add (forward semantics are identical).
    pos_emb = 0.1 * jax.random.normal(kp, (1, n_patches, in_channels), dtype=jnp.float32)

    out = channel_embeddings_pallas(x, conv_w, conv_b, pos_emb, patchsize)
    out = jax.block_until_ready(out)

    ref = channel_embeddings_reference(x, conv_w, conv_b, pos_emb, patchsize)
    assert out.shape == (batch, n_patches, in_channels), out.shape
    assert jnp.allclose(out, ref, atol=1e-5, rtol=1e-5), "mismatch vs reference"

    print("KERNEL_OK")
</pallas_src>

<mosaic_0001>
module attributes {stable_mosaic.version = 11 : i64} {
  func.func @_patch_embed_kernel(%arg0: i32, %arg1: i32, %arg2: memref<1x16x128xf32, #tpu.memory_space<vmem>>, %arg3: memref<128x128xf32, #tpu.memory_space<vmem>>, %arg4: memref<1x128xf32, #tpu.memory_space<vmem>>, %arg5: memref<16x128xf32, #tpu.memory_space<vmem>>, %arg6: memref<1x16x128xf32, #tpu.memory_space<vmem>>) attributes {dimension_semantics = [#tpu.dimension_semantics<parallel>, #tpu.dimension_semantics<parallel>], iteration_bounds = array<i64: 2, 1>, scalar_prefetch = 0 : i64, scratch_operands = 0 : i64, tpu.core_type = #tpu.core_type<tc>, window_params = [{transform_indices = @transform_0, window_bounds = array<i64: 1, 16, 128>}, {pipeline_mode = #tpu.pipeline_mode<synchronous>, transform_indices = @transform_1, window_bounds = array<i64: 128, 128>}, {pipeline_mode = #tpu.pipeline_mode<synchronous>, transform_indices = @transform_2, window_bounds = array<i64: 1, 128>}, {transform_indices = @transform_3, window_bounds = array<i64: 16, 128>}, {transform_indices = @transform_4, window_bounds = array<i64: 1, 16, 128>}]} {
    %c0 = arith.constant 0 : index
    %c0_0 = arith.constant 0 : index
    %c0_1 = arith.constant 0 : index
    %0 = vector.load %arg2[%c0, %c0_0, %c0_1] : memref<1x16x128xf32, #tpu.memory_space<vmem>>, vector<1x16x128xf32>
    %1 = vector.shape_cast %0 : vector<1x16x128xf32> to vector<16x128xf32>
    %c0_2 = arith.constant 0 : index
    %c0_3 = arith.constant 0 : index
    %2 = vector.load %arg3[%c0_2, %c0_3] : memref<128x128xf32, #tpu.memory_space<vmem>>, vector<128x128xf32>
    %cst = arith.constant dense<0.000000e+00> : vector<16x128xf32>
    %3 = tpu.matmul %1, %2, %cst {dimension_numbers = #tpu.dot_dimension_numbers<[1], [0], [0], [1], [0, 0, 1, 1], [], []>} : vector<16x128xf32>, vector<128x128xf32>, vector<16x128xf32> -> vector<16x128xf32>
    %c0_4 = arith.constant 0 : index
    %c0_5 = arith.constant 0 : index
    %4 = vector.load %arg4[%c0_4, %c0_5] : memref<1x128xf32, #tpu.memory_space<vmem>>, vector<1x128xf32>
    %5 = vector.broadcast %4 : vector<1x128xf32> to vector<16x128xf32>
    %6 = arith.addf %3, %5 : vector<16x128xf32>
    %c0_6 = arith.constant 0 : index
    %c0_7 = arith.constant 0 : index
    %7 = vector.load %arg5[%c0_6, %c0_7] : memref<16x128xf32, #tpu.memory_space<vmem>>, vector<16x128xf32>
    %8 = arith.addf %6, %7 : vector<16x128xf32>
    %c0_8 = arith.constant 0 : index
    %c0_9 = arith.constant 0 : index
    %c0_10 = arith.constant 0 : index
    %9 = vector.load %arg6[%c0_8, %c0_9, %c0_10] : memref<1x16x128xf32, #tpu.memory_space<vmem>>, vector<1x16x128xf32>
    %10 = vector.shape_cast %9 : vector<1x16x128xf32> to vector<16x128xf32>
    %11 = vector.shape_cast %8 : vector<16x128xf32> to vector<1x16x128xf32>
    tpu.vector_store %arg6[%c0_8, %c0_9, %c0_10], %11 {strides = array<i32>} : memref<1x16x128xf32, #tpu.memory_space<vmem>>, vector<1x16x128xf32>,
    return
  }
  func.func @transform_0(%arg0: i32, %arg1: i32) -> (i32, i32, i32) {
    %c0_i32 = arith.constant 0 : i32
    %c0_i32_0 = arith.constant 0 : i32
    return %arg0, %arg1, %c0_i32 : i32, i32, i32
  }
  func.func @transform_1(%arg0: i32, %arg1: i32) -> (i32, i32) {
    %c0_i32 = arith.constant 0 : i32
    %c0_i32_0 = arith.constant 0 : i32
    %c0_i32_1 = arith.constant 0 : i32
    return %c0_i32, %c0_i32_0 : i32, i32
  }
  func.func @transform_2(%arg0: i32, %arg1: i32) -> (i32, i32) {
    %c0_i32 = arith.constant 0 : i32
    %c0_i32_0 = arith.constant 0 : i32
    %c0_i32_1 = arith.constant 0 : i32
    return %c0_i32, %c0_i32_0 : i32, i32
  }
  func.func @transform_3(%arg0: i32, %arg1: i32) -> (i32, i32) {
    %c0_i32 = arith.constant 0 : i32
    %c0_i32_0 = arith.constant 0 : i32
    return %arg1, %c0_i32 : i32, i32
  }
  func.func @transform_4(%arg0: i32, %arg1: i32) -> (i32, i32, i32) {
    %c0_i32 = arith.constant 0 : i32
    %c0_i32_0 = arith.constant 0 : i32
    return %arg0, %arg1, %c0_i32 : i32, i32, i32
  }
}

</mosaic_0001>

<bundles_post_ra>
// kernel: tpu_custom_call.1
= control target key start
LH: loop header
LB: loop body
LE: loop exit
PB: predicated region body
PF: predicated region fallthrough
CT: control target
= control target key end

     0   :  { %9 = vsyncpa [#allocation3], 0  ;;  %s1271_s0 = inlined_call_operand.hbm [shape: f32[2,16,128], index: 0, kind: input, shape index: {}]   ;;  %s1272_s1 = inlined_call_operand.hbm [shape: f32[128,128], index: 1, kind: input, shape index: {}]   ;;  %s1273_s2 = inlined_call_operand.hbm [shape: f32[1,128], index: 2, kind: input, shape index: {}]   ;;  %s1274_s3 = inlined_call_operand.hbm [shape: f32[16,128], index: 3, kind: input, shape index: {}]   ;;  %s1275_s4 = inlined_call_operand.hbm [shape: f32[2,16,128], index: 4, kind: output, shape index: {}]  }
   0x1   :  { %11 = vsyncpa [#allocation3 + $0x1], 0 }
   0x2   :  { %12 = vsyncpa [#allocation6], 0 }
   0x3   :  { %13 = vsyncpa [#allocation9], 0 }
   0x4   :  { %14 = vsyncpa [#allocation4], 0 }
   0x5   :  { %16 = vsyncpa [#allocation4 + $0x1], 0  ;;  %s973_s15 = smov 0   ;;  %s975_s16 = smov 0  }
   0x6   :  { %s977_s17 = smov 0   ;;  %s979_s18 = smov 0  }
   0x7   :  { %s981_s19 = smov 0   ;;  %s983_s20 = smov 0  }
   0x8 LB: > { %s527_s21 = sadd.s32 4294967295, %s937_s20   ;;  %s528_s22 = sadd.s32 4294967294, %s937_s20   ;;  %s937_s20 = sphi %s983_s20, %s22_s20   ;;  %s933_s19 = sphi %s981_s19, %s1302_s19   ;;  %s929_s18 = sphi %s979_s18, %s1301_s18   ;;  %s925_s17 = sphi %s977_s17, %s1300_s17   ;;  %s921_s16 = sphi %s975_s16, %s1299_s16   ;;  %s917_s15 = sphi %s973_s15, %s1298_s15  }
   0x9   : > { %p56_p0 = scmp.ne.s32.totalorder %s921_s16, %s917_s15  ;;  %p1007_p1 = scmp.eq.s32.totalorder %s527_s21, 0 }
   0xa   : > { %p1011_p2 = scmp.eq.s32.totalorder %s527_s21, 1  ;;  %p156_p3 = scmp.eq.s32.totalorder %s528_s22, 1 }
   0xb   : > { %s1281_s23 = scalar_select %p1007_p1, 1, 0 }
   0xc   : > { %s1282_s24 = scalar_select %p1011_p2, 1, 0 }
   0xd   : > { %p1017_p4 = por %p1007_p1, %p56_p0  ;;  %p529_p5 = scmp.ge.s32.totalorder %s937_s20, 1 }
   0xe   : > { %p1022_p6 = por %p156_p3, %p56_p0  ;;  %p163_p7 = scmp.lt.s32.totalorder %s937_s20, 3 }
   0xf   : > { %s1283_s25 = scalar_select %p1017_p4, 1, 0 }
  0x10   : > { %s1284_s26 = scalar_select %p1022_p6, 1, 0 }
  0x11   : > { %p1027_p8 = pnand %p529_p5, %p163_p7  ;;  %s939_s28 = smov [#allocation5]  }
  0x12   : > { %1285 = sst [smem:[#allocation15_spill]] %s1284_s26  ;;  %s175_s29 = sshll.u32 %s939_s28, 4  ;;  %s1031_s29 = int_to_ptr.vmem [resolvable:$true] %s175_s29 }
  0x13   : > { %s1286_s27 = scalar_select %p1027_p8, 1, 0 }
  0x14   : > { %p652_p9 = pneg %p1027_p8  ;;  %s940_s5 = smov [#allocation7]  }
  0x15   : > { %s189_s6 = sshll.u32 %s940_s5, 4  ;;  %s941_s7 = smov [#allocation8]   ;;  %s1042_s6 = int_to_ptr.vmem [resolvable:$true] %s189_s6 }
  0x16   : > { %p1038_p11 = pnand %p652_p9, %p1007_p1  ;;  %s1044_s8 = sshll.u32 %s941_s7, 4  ;;  %s203_s8 = int_to_ptr.vmem [resolvable:$true] %s1044_s8 }
  0x17   : > { %s733_s11 = scalar_lea.hbm %s1272_s1, 2048 }
  0x18   : > { %p734_p12 = scmp.ne.s32.totalorder %s1272_s1, %s733_s11  ;;  %p1054_p13 = pneg %p1038_p11 }
  0x19   : > { %p740_p5 = scmp.lt.u32.totalorder %s733_s11, %s1272_s1 }
  0x1a   : > { %p736_p0 = pnand %p1054_p13, %p734_p12 }
  0x1c   : > { %p737_p3 = pneg %p736_p0 }
  0x1e   : > { %p742_p7 = pnand %p740_p5, %p737_p3 }
  0x20   : > { %745 = shalt.err (!%p742_p7)
}
  0x21   : > { %s746_s28 = scalar_lea.vmem %s1031_s29, 2048  ;;  %p754_p1 = scmp.lt.s32.totalorder %s1031_s29, %s1031_s29 }
  0x22   : > { %p747_p9 = scmp.ne.s32.totalorder %s1031_s29, %s746_s28  ;;  %p755_p4 = scmp.lt.s32.totalorder %s746_s28, %s746_s28 }
  0x24   : > { %p749_p10 = pnand %p747_p9, %p1054_p13  ;;  %p756_p12 = por %p755_p4, %p754_p1 }
  0x26   : > { %p750_p6 = pneg %p749_p10 }
  0x28   : > { %p757_p0 = pnand %p756_p12, %p750_p6 }
  0x2a   : > { %760 = shalt.err (!%p757_p0)
}
  0x2b   : > { %s942_s5 = smov 128   ;;  %s943_s7 = smov 8  }
  0x2c   : > { %655 = dma.hbm_to_vmem [thread:$0]  (!%p1038_p11), %s1272_s1, 2048, %s1031_s29, [#allocation6], %s942_s5, %s942_s5, %s943_s7  }
  0x2d   : > { %s761_s13 = scalar_lea.hbm %s1273_s2, 16 }
  0x2e   : > { %p762_p1 = scmp.ne.s32.totalorder %s1273_s2, %s761_s13  ;;  %p768_p10 = scmp.lt.u32.totalorder %s761_s13, %s1273_s2 }
  0x30   : > { %p764_p4 = pnand %p762_p1, %p1054_p13 }
  0x32   : > { %p765_p6 = pneg %p764_p4 }
  0x34   : > { %p770_p3 = pnand %p768_p10, %p765_p6 }
  0x36   : > { %773 = shalt.err (!%p770_p3)
}
  0x37   : > { %s774_s29 = scalar_lea.vmem %s1042_s6, 16  ;;  %s781_s9 = scalar_lea.vmem %s1042_s6, 32 }
  0x38   : > { %p775_p5 = scmp.ne.s32.totalorder %s1042_s6, %s774_s29  ;;  %p782_p12 = scmp.lt.s32.totalorder %s1042_s6, %s1042_s6 }
  0x39   : > { %p783_p0 = scmp.lt.s32.totalorder %s781_s9, %s774_s29 }
  0x3a   : > { %p777_p7 = pnand %p775_p5, %p1054_p13 }
  0x3b   : > { %p784_p1 = por %p783_p0, %p782_p12 }
  0x3c   : > { %p778_p9 = pneg %p777_p7 }
  0x3e   : > { %p785_p4 = pnand %p784_p1, %p778_p9 }
  0x40   : > { %788 = shalt.err (!%p785_p4)
}
  0x41   : > { %658 = dma.hbm_to_vmem [thread:$0]  (!%p1038_p11), %s1273_s2, 16, %s1042_s6, [#allocation6]  }
  0x42   : > { %s789_s13 = scalar_lea.hbm %s1274_s3, 256 }
  0x43   : > { %p790_p6 = scmp.ne.s32.totalorder %s1274_s3, %s789_s13  ;;  %p796_p5 = scmp.lt.u32.totalorder %s789_s13, %s1274_s3 }
  0x45   : > { %p792_p10 = pnand %p790_p6, %p1054_p13 }
  0x47   : > { %p793_p3 = pneg %p792_p10 }
  0x49   : > { %p798_p7 = pnand %p796_p5, %p793_p3 }
  0x4b   : > { %801 = shalt.err (!%p798_p7)
}
  0x4c   : > { %s802_s9 = scalar_lea.vmem %s203_s8, 256  ;;  %p810_p1 = scmp.lt.s32.totalorder %s203_s8, %s203_s8 }
  0x4d   : > { %p803_p9 = scmp.ne.s32.totalorder %s203_s8, %s802_s9  ;;  %p811_p4 = scmp.lt.s32.totalorder %s802_s9, %s802_s9 }
  0x4f   : > { %p805_p12 = pnand %p803_p9, %p1054_p13  ;;  %p812_p8 = por %p811_p4, %p810_p1 }
  0x51   : > { %p806_p0 = pneg %p805_p12 }
  0x53   : > { %p813_p2 = pnand %p812_p8, %p806_p0 }
  0x55   : > { %816 = shalt.err (!%p813_p2)
}
  0x56   : > { %661 = dma.hbm_to_vmem [thread:$0]  (!%p1038_p11), %s1274_s3, 256, %s203_s8, [#allocation9], %s942_s5, %s942_s5, %s943_s7  }
  0x57   : > { %s43_s14 = sadd.s32 1, %s925_s17  ;;  %s34_s30 = sadd.s32 1, %s933_s19 }
  0x58   : > { %p50_p2 = scmp.ne.s32.totalorder %s925_s17, %s921_s16  ;;  %p36_p8 = scmp.ge.s32.totalorder %s34_s30, 2 }
  0x59   : > { %p51_p13 = scmp.eq.s32.totalorder %s937_s20, 0  ;;  %p1289_p6 = scmp.ne.s32.totalorder %s1282_s24, 0 }
  0x5a   : > { %p673_p3 = scmp.lt.s32.totalorder %s937_s20, 2  ;;  %s1304_s30 = smov (%p36_p8, %s34_s30), 0 }
  0x5b   : > { %p1131_p10 = por %p1289_p6, %p50_p2  ;;  %p52_p5 = por %p51_p13, %p50_p2 }
  0x5c   : > { %s216_s11 = sand.u32 1, %s925_s17   ;;  %s38_s12 = ssub.s32 %s933_s19, %s1304_s30 }
  0x5d   : > { %p41_p7 = scmp.eq.s32.totalorder %s38_s12, 0  ;;  %s534_s8 = sshll.u32 %s216_s11, 4 }
  0x5e   : > { %s549_s13 = sshll.u32 %s933_s19, 8  ;;  %s220_s29 = scalar_lea.vmem [#allocation2], %s534_s8 }
  0x5f   : > { %s1143_s21 = scalar_select %p41_p7, %s925_s17, %s43_s14  }
  0x60   : > { %s1148_s24 = scalar_lea.hbm %s1271_s0, %s549_s13  ;;  %s229_s9 = sshll.u32 %s220_s29, 4  ;;  %s1150_s9 = int_to_ptr.vmem [resolvable:$true] %s229_s9 }
  0x61   : > { %p1154_p11 = pnand %p673_p3, %p52_p5  ;;  %s1158_s26 = scalar_lea.sflag [#allocation3], %s216_s11 }
  0x62   : > { %s817_s14 = scalar_lea.hbm %s1148_s24, 256  ;;  %s822_s13 = scalar_lea.hbm %s1271_s0, 512 }
  0x63   : > { %p818_p9 = scmp.ne.s32.totalorder %s1148_s24, %s817_s14  ;;  %p819_p12 = pneg %p1154_p11 }
  0x64   : > { %p823_p4 = scmp.lt.u32.totalorder %s1148_s24, %s1271_s0  ;;  %p824_p2 = scmp.lt.u32.totalorder %s822_s13, %s817_s14 }
  0x65   : > { %p820_p0 = pnand %p819_p12, %p818_p9  ;;  %p826_p13 = scmp.lt.u32.totalorder %s817_s14, %s1148_s24 }
  0x66   : > { %p825_p8 = por %p824_p2, %p823_p4 }
  0x67   : > { %p821_p1 = pneg %p820_p0 }
  0x68   : > { %p827_p6 = por %p826_p13, %p825_p8 }
  0x6a   : > { %p828_p3 = pnand %p827_p6, %p821_p1 }
  0x6c   : > { %831 = shalt.err (!%p828_p3)
}
  0x6d   : > { %s832_s11 = scalar_lea.vmem %s1150_s9, 256  ;;  %s944_s29 = smov [#allocation2]  }
  0x6e   : > { %p833_p5 = scmp.ne.s32.totalorder %s1150_s9, %s832_s11  ;;  %s837_s12 = sshll.u32 %s944_s29, 4  ;;  %s838_s12 = int_to_ptr.vmem [resolvable:$false] %s837_s12 }
  0x6f   : > { %s839_s8 = scalar_lea.vmem %s838_s12, 512  ;;  %p840_p0 = scmp.lt.s32.totalorder %s1150_s9, %s838_s12 }
  0x70   : > { %p835_p7 = pnand %p833_p5, %p819_p12  ;;  %p841_p4 = scmp.lt.s32.totalorder %s839_s8, %s832_s11 }
  0x72   : > { %p836_p9 = pneg %p835_p7  ;;  %p842_p2 = por %p841_p4, %p840_p0 }
  0x74   : > { %p843_p8 = pnand %p842_p2, %p836_p9 }
  0x76   : > { %846 = shalt.err (!%p843_p8)
}
  0x77   : > { %665 = dma.hbm_to_vmem [thread:$0]  (!%p1154_p11), %s1148_s24, 256, %s1150_s9, %s1158_s26, %s942_s5, %s942_s5, %s943_s7  }
  0x78   : > { %p1292_p12 = scmp.ne.s32.totalorder %s1286_s27, 0 }
  0x79   : > { %s1192_s14 = sand.u32 (!%p1292_p12), 1, %s921_s16   ;;  %p1293_p1 = scmp.ne.s32.totalorder (!%p1292_p12), %s1283_s25, 0 }
  0x7a   : > { %241 = sbr.rel (%p1292_p12) target bundleno = 402 (0x192), region = 36  ;;  %s538_s13 = sshll.u32 (!%p1292_p12), %s1192_s14, 4 }
  0x7b   : > { %s244_s22 = scalar_lea.sflag (!%p1292_p12), [#allocation3], %s1192_s14  ;;  %s1198_s6 = scalar_lea.vmem (!%p1292_p12), [#allocation2], %s538_s13 }
  0x81   : > { %900 = dma.done.wait (%p1293_p1), %s244_s22, 256  }
  0x82   : > { %902 = vsyncadd (%p1293_p1), %s244_s22, 4294967040  ;;  %p1294_p11 = scmp.ne.s32.totalorder %s1281_s23, 0 }
  0x84   : > { %904 = dma.done.wait (%p1294_p11), [#allocation6], 2064  }
  0x85   : > { %906 = vsyncadd (%p1294_p11), [#allocation6], 4294965232 }
  0x86   : > { %908 = dma.done.wait (%p1294_p11), [#allocation9], 256  }
  0x87   : > { %910 = vsyncadd (%p1294_p11), [#allocation9], 4294967040  ;;  %v289_v0 = vld [vmem:[#allocation5] sm:$0xff]  ;;  %v290_v1 = vld [vmem:[#allocation5 + $0x8] sm:$0xff]  ;;  %s283_s23 = scalar_lea.vmem [#allocation10], %s538_s13  ;;  %s550_s27 = sshll.u32 %s929_s18, 8 }
  0x88   : > { %v291_v2 = vld [vmem:[#allocation5 + $0x10] sm:$0xff]  ;;  %v604_v3 = vpack.c.bf16 %v290_v1, %v289_v0  ;;  %v292_v4 = vld [vmem:[#allocation5 + $0x18] sm:$0xff]  ;;  %v293_v6 = vld [vmem:[#allocation5 + $0x20] sm:$0xff]  ;;  %s409_s25 = sshll.u32 %s283_s23, 4  ;;  %s1222_s24 = scalar_lea.hbm %s1275_s4, %s550_s27  ;;  %s1217_s25 = int_to_ptr.vmem [resolvable:$true] %s409_s25 }
  0x89   : > { %v608_v5 = vpack.c.bf16 %v292_v4, %v291_v2  ;;  %v294_v7 = vld [vmem:[#allocation5 + $0x28] sm:$0xff]  ;;  %v287_v9 = vld [vmem:[%s1198_s6] sm:$0xff]  ;;  %v296_v11 = vld [vmem:[#allocation5 + $0x38] sm:$0xff]  ;;  %s394_s9 = scalar_lea.sflag [#allocation4], %s1192_s14  ;;  %s847_s18 = scalar_lea.vmem %s1217_s25, 256 }
  0x8a   : > { %605 = vmatprep.subr.bf16.mxu0 %v604_v3  ;;  %v612_v8 = vpack.c.bf16 %v294_v7, %v293_v6  ;;  %v295_v10 = vld [vmem:[#allocation5 + $0x30] sm:$0xff]  ;;  %601 = vmatprep.mubr.f32.mxu0 %v287_v9  ;;  %v297_v13 = vld [vmem:[#allocation5 + $0x40] sm:$0xff]  ;;  %v298_v14 = vld [vmem:[#allocation5 + $0x48] sm:$0xff]  ;;  %p848_p13 = scmp.ne.s32.totalorder %s1217_s25, %s847_s18  ;;  %s945_s26 = smov [#allocation10]  }
  0x8b   : > { %607 = vmatpush3.bf16.msra.mxu0 %v604_v3  ;;  %v616_v12 = vpack.c.bf16 %v296_v11, %v295_v10  ;;  %v620_v15 = vpack.c.bf16 %v298_v14, %v297_v13  ;;  %v299_v16 = vld [vmem:[#allocation5 + $0x50] sm:$0xff]  ;;  %v300_v17 = vld [vmem:[#allocation5 + $0x58] sm:$0xff]  ;;  %v301_v19 = vld [vmem:[#allocation5 + $0x60] sm:$0xff]  ;;  %s851_s28 = sshll.u32 %s945_s26, 4  ;;  %s852_s28 = int_to_ptr.vmem [resolvable:$false] %s851_s28 }
  0x8c   : > { %609 = vmatprep.subr.bf16.mxu0 %v608_v5  ;;  %v624_v18 = vpack.c.bf16 %v300_v17, %v299_v16  ;;  %v302_v20 = vld [vmem:[#allocation5 + $0x68] sm:$0xff]  ;;  %v303_v22 = vld [vmem:[#allocation5 + $0x70] sm:$0xff]  ;;  %v304_v23 = vld [vmem:[#allocation5 + $0x78] sm:$0xff]  ;;  %p849_p6 = pnand %p848_p13, %p1131_p10  ;;  %s853_s11 = scalar_lea.vmem %s852_s28, 512 }
  0x8d   : > { %v628_v21 = vpack.c.bf16 %v302_v20, %v301_v19  ;;  %v632_v24 = vpack.c.bf16 %v304_v23, %v303_v22  ;;  %v288_v25 = vld [vmem:[%s1198_s6 + $0x8] sm:$0xff]  ;;  %v543_v26 = vld [vmem:[#allocation7] ss:$0 sm:$0xff]  ;;  %p854_p5 = scmp.lt.s32.totalorder %s1217_s25, %s852_s28  ;;  %p855_p7 = scmp.lt.s32.totalorder %s853_s11, %s847_s18 }
  0x8e   : > { %v388_v28 = vld [vmem:[#allocation8 + $0x8] sm:$0xff]  ;;  %v387_v31 = vld [vmem:[#allocation8] sm:$0xff]  ;;  %p850_p3 = pneg %p849_p6 }
  0x8f   : > { %611 = vmatpush3.bf16.msra.mxu0 %v608_v5  ;;  %p856_p9 = por %p855_p7, %p854_p5 }
  0x90   : > { %613 = vmatprep.subr.bf16.mxu0 %v612_v8 }
  0x91   : > { %p857_p0 = pnand %p856_p9, %p850_p3 }
  0x93   : > { %615 = vmatpush3.bf16.msra.mxu0 %v612_v8 }
  0x94   : > { %617 = vmatprep.subr.bf16.mxu0 %v616_v12 }
  0x97   : > { %619 = vmatpush3.bf16.msra.mxu0 %v616_v12 }
  0x98   : > { %621 = vmatprep.subr.bf16.mxu0 %v620_v15 }
  0x9b   : > { %623 = vmatpush3.bf16.msra.mxu0 %v620_v15 }
  0x9c   : > { %625 = vmatprep.subr.bf16.mxu0 %v624_v18 }
  0x9f   : > { %627 = vmatpush3.bf16.msra.mxu0 %v624_v18 }
  0xa0   : > { %629 = vmatprep.subr.bf16.mxu0 %v628_v21 }
  0xa3   : > { %631 = vmatpush3.bf16.msra.mxu0 %v628_v21 }
  0xa4   : > { %633 = vmatprep.subr.bf16.mxu0 %v632_v24 }
  0xa7   : > { %635 = vmatpush3.bf16.msra.mxu0 %v632_v24 }
  0xaa   : > { %602 = vmatmul.mubr.f32.vlgmr.msra.gmra.mrb[0].mxu0 %v288_v25 }
 0x17d   : > { %v603_v27 = vpop.f32.mrb[0].mxu0 }
 0x17e   : > { %v384_v29 = vadd.f32 %v603_v27, %v543_v26  ;;  %v378_v30 = vpop.f32.mrb[1].mxu0 }
 0x17f   : > { %v379_v32 = vadd.f32 %v543_v26, %v378_v30 }
 0x180   : > { %v390_v33 = vadd.f32 %v388_v28, %v384_v29 }
 0x181   : > { %v389_v34 = vadd.f32 %v387_v31, %v379_v32 }
 0x182   : > { %392 = vst [vmem:[%s283_s23 + $0x8] sm:$0xff] %v390_v33 }
 0x183   : > { %391 = vst [vmem:[%s283_s23] sm:$0xff] %v389_v34 }
 0x184   : > { %860 = shalt.err (!%p857_p0)
}
 0x185   : > { %s861_s29 = scalar_lea.hbm %s1222_s24, 256  ;;  %s865_s13 = scalar_lea.hbm %s1275_s4, 512 }
 0x186   : > { %p862_p4 = scmp.ne.s32.totalorder %s1222_s24, %s861_s29  ;;  %p866_p12 = scmp.lt.u32.totalorder %s1222_s24, %s1275_s4 }
 0x187   : > { %p867_p1 = scmp.lt.u32.totalorder %s865_s13, %s861_s29  ;;  %p869_p13 = scmp.lt.u32.totalorder %s861_s29, %s1222_s24 }
 0x188   : > { %p863_p2 = pnand %p862_p4, %p1131_p10 }
 0x189   : > { %p868_p11 = por %p867_p1, %p866_p12 }
 0x18a   : > { %p864_p8 = pneg %p863_p2 }
 0x18b   : > { %p870_p6 = por %p869_p13, %p868_p11 }
 0x18d   : > { %p871_p3 = pnand %p870_p6, %p864_p8 }
 0x18f   : > { %874 = shalt.err (!%p871_p3)
}
 0x190   : > { %s946_s23 = smov 128   ;;  %s947_s27 = smov 8  }
 0x191   : > { %650 = dma.vmem_to_hbm [thread:$0]  (%p1131_p10), %s1217_s25, 256, %s1222_s24, %s394_s9, %s946_s23, %s946_s23, %s947_s27  }
 0x192 PF: > { %s1295_s5 = sld [smem:[#allocation15_spill]]  ;;  %s424_s7 = sand.u32 1, %s917_s15  }
 0x193   : > { %p1297_p7 = scmp.ge.s32.totalorder %s937_s20, 2  ;;  %s425_s18 = scalar_lea.sflag [#allocation4], %s424_s7 }
 0x198   : > { %p1296_p5 = scmp.ne.s32.totalorder %s1295_s5, 0 }
 0x19a   : > { %p667_p9 = pnand %p1297_p7, %p1296_p5 }
 0x19c   : > { %912 = dma.done.wait (!%p667_p9), %s425_s18, 256  }
 0x19d   : > { %914 = vsyncadd (!%p667_p9), %s425_s18, 4294967040  ;;  %s22_s20 = sadd.s32 1, %s937_s20   ;;  %s1298_s15 = smov %s921_s16 }
 0x19e   : > { %p19_p0 = scmp.ge.s32.totalorder %s22_s20, 4   ;;  %s1299_s16 = smov %s925_s17 }
 0x19f   : > { %s1300_s17 = smov %s1143_s21  ;;  %s1301_s18 = smov %s933_s19 }
 0x1a0   : > { %s1302_s19 = smov %s1304_s30  ;;  %21 = sbr.rel (!%p19_p0) target bundleno = 8 (0x8), region = 94 }
 0x1a7   :  { %430 = vsyncpa [#allocation3], 1 }
 0x1a8   :  { %432 = vsyncpa [#allocation3 + $0x1], 1 }
 0x1a9   :  { %433 = vsyncpa [#allocation6], 1 }
 0x1aa   :  { %434 = vsyncpa [#allocation9], 1 }
 0x1ab   :  { %435 = vsyncpa [#allocation4], 1 }
 0x1ac   :  { %437 = vsyncpa [#allocation4 + $0x1], 1 }

</bundles_post_ra>
